<compile_context>
chip_gen: v5e
topology: v5e:2x2
jax: 0.10.0
libtpu: 0.0.40
codegen_flags: <defaults>
</compile_context>

<pallas_src>
import functools

import jax
import jax.numpy as jnp
from jax.experimental import pallas as pl
from jax.experimental.pallas import tpu as pltpu


def _round_up(x, m):
    return ((x + m - 1) // m) * m


def _cdiv(a, b):
    return (a + b - 1) // b


def _vmem_capacity_bytes():
    """Physical VMEM per TensorCore; conservative 64 MiB (v7x) fallback."""
    try:
        cap = getattr(pltpu.get_tpu_info(), "vmem_capacity_bytes", None)
        if cap:
            return int(cap)
    except Exception:
        pass
    return 64 << 20


# ----------------------------- single-pass kernel ----------------------------

def _mean_only_bn_kernel(x_ref, bias_ref, o_ref, *, inv_hw):
    # x_ref:    (tile_rows, HW)  rows = (n, c) pairs, lanes = full spatial extent
    # bias_ref: (tile_rows, 1)   per-row (per-channel, repeated over N) bias
    # o_ref:    (tile_rows, HW)
    x = x_ref[...].astype(jnp.float32)
    mean = jnp.sum(x, axis=-1, keepdims=True) * inv_hw
    shift = bias_ref[...].astype(jnp.float32) - mean       # fused "x - mean + bias"
    o_ref[...] = (x + shift).astype(o_ref.dtype)


# -------------------------- two-pass (very large HW) --------------------------

def _row_sum_kernel(x_ref, sum_ref, *, hw_total, hw_tile):
    h = pl.program_id(1)

    @pl.when(h == 0)
    def _():
        sum_ref[...] = jnp.zeros_like(sum_ref)

    x = x_ref[...].astype(jnp.float32)
    # Mask lanes past the true spatial extent (edge HW block may read OOB garbage).
    lane = jax.lax.broadcasted_iota(jnp.int32, x.shape, 1)
    valid = (h * hw_tile + lane) < hw_total
    sum_ref[...] += jnp.sum(jnp.where(valid, x, 0.0), axis=-1, keepdims=True)


def _apply_shift_kernel(x_ref, shift_ref, o_ref):
    o_ref[...] = (x_ref[...].astype(jnp.float32) + shift_ref[...]).astype(o_ref.dtype)


def _mean_only_bn_two_pass(x2d, bias_rows, vmem_cap, hw_tile=None):
    NC, HW = x2d.shape
    x_item = jnp.dtype(x2d.dtype).itemsize
    tile_rows = NC if NC <= 8 else 8
    if hw_tile is None:
        budget_elems = (4 << 20) // (tile_rows * x_item)        # ~4 MiB x blocks
        hw_tile = HW if HW <= budget_elems else max(128, (budget_elems // 128) * 128)
    grid = (_cdiv(NC, tile_rows), _cdiv(HW, hw_tile))
    cparams = pltpu.CompilerParams(
        dimension_semantics=("parallel", "arbitrary"),
        vmem_limit_bytes=int(min(40 << 20, vmem_cap)),
    )

    # Pass 1: per-row sums (output block resident across the HW axis).
    row_sums = pl.pallas_call(
        functools.partial(_row_sum_kernel, hw_total=HW, hw_tile=hw_tile),
        out_shape=jax.ShapeDtypeStruct((NC, 1), jnp.float32),
        grid_spec=pltpu.PrefetchScalarGridSpec(
            num_scalar_prefetch=0,
            grid=grid,
            in_specs=[pl.BlockSpec((tile_rows, hw_tile), lambda i, h: (i, h))],
            out_specs=pl.BlockSpec((tile_rows, 1), lambda i, h: (i, 0)),
        ),
        compiler_params=cparams,
        cost_estimate=pl.CostEstimate(
            flops=NC * HW, transcendentals=0, bytes_accessed=NC * HW * x_item),
    )(x2d)

    # Tiny (NC, 1) math stays in XLA: shift = bias - mean.
    shift = bias_rows.astype(jnp.float32) - row_sums * jnp.float32(1.0 / HW)

    # Pass 2: streamed x + (bias - mean).
    return pl.pallas_call(
        _apply_shift_kernel,
        out_shape=jax.ShapeDtypeStruct((NC, HW), x2d.dtype),
        grid_spec=pltpu.PrefetchScalarGridSpec(
            num_scalar_prefetch=0,
            grid=grid,
            in_specs=[pl.BlockSpec((tile_rows, hw_tile), lambda i, h: (i, h)),
                      pl.BlockSpec((tile_rows, 1), lambda i, h: (i, 0))],
            out_specs=pl.BlockSpec((tile_rows, hw_tile), lambda i, h: (i, h)),
        ),
        compiler_params=cparams,
        cost_estimate=pl.CostEstimate(
            flops=NC * HW, transcendentals=0, bytes_accessed=2 * NC * HW * x_item),
    )(x2d, shift)


# --------------------------------- wrapper ------------------------------------

def _pick_tile_rows(NC, rows_fit):
    """Rows per block: VMEM-budgeted, multiple of 8 (or == NC), never > NC,
    preferring an even grid of >= 4 steps for the v7x 2-TensorCore split."""
    if NC <= 8 or (rows_fit >= NC and NC < 32):
        return NC                                   # one full-extent block (always legal)
    cap = max(8, min((rows_fit // 8) * 8, (NC // 8) * 8))
    if NC < 32:
        return cap
    tile = min(cap, _round_up(_cdiv(NC, 4), 8))     # >= 4 steps when NC allows
    steps = _cdiv(NC, tile)
    if steps % 2 == 1:                              # nudge to an even step count
        cand = max(8, _round_up(_cdiv(NC, steps + 1), 8))
        if cand <= cap and _cdiv(NC, cand) % 2 == 0:
            tile = cand
    return tile


def mean_only_batch_norm(x, bias, *, force_two_pass=False, _two_pass_hw_tile=None):
    """x: (N, C, H, W); bias: (C,). Returns x - mean_hw(x) + bias, shape (N, C, H, W)."""
    N, C, H, W = x.shape
    NC, HW = N * C, H * W
    x_item = jnp.dtype(x.dtype).itemsize
    b_item = jnp.dtype(bias.dtype).itemsize

    x2d = x.reshape(NC, HW)                          # no padding: block last dim == HW
    bias_rows = jnp.broadcast_to(bias[None, :], (N, C)).reshape(NC, 1)

    # Per-generation VMEM budget.
    cap = _vmem_capacity_bytes()
    if cap >= (112 << 20):            # v5e / v6e: 128 MiB physical VMEM
        live_budget, vmem_cap = 64 << 20, 100 << 20
    else:                             # v7x: 64 MiB physical VMEM
        live_budget, vmem_cap = 32 << 20, 56 << 20

    # Live VMEM per row (double-buffered): x-in + x-out (lane-padded to 128) plus
    # the (rows, 1) bias column, which is lane-padded to a full 128-wide vreg row.
    HW_vmem = _round_up(HW, 128)
    row_bytes = 2 * HW_vmem * x_item + 128 * b_item
    rows_fit = max(1, live_budget // (2 * row_bytes))

    if force_two_pass or (rows_fit < 8 and rows_fit < NC):
        # HW too large for even an 8-row resident block: 2-pass (row sums, then shift).
        out2d = _mean_only_bn_two_pass(x2d, bias_rows, vmem_cap,
                                       hw_tile=_two_pass_hw_tile)
        return out2d.reshape(N, C, H, W)

    tile_rows = _pick_tile_rows(NC, rows_fit)
    grid = (_cdiv(NC, tile_rows),)
    vmem_limit = int(min(max(2 * tile_rows * row_bytes + (4 << 20), 32 << 20), vmem_cap))

    kernel = functools.partial(_mean_only_bn_kernel, inv_hw=float(1.0 / HW))
    out2d = pl.pallas_call(
        kernel,
        out_shape=jax.ShapeDtypeStruct((NC, HW), x.dtype),
        grid_spec=pltpu.PrefetchScalarGridSpec(
            num_scalar_prefetch=0,
            grid=grid,
            in_specs=[
                pl.BlockSpec((tile_rows, HW), lambda i: (i, 0)),
                pl.BlockSpec((tile_rows, 1), lambda i: (i, 0)),
            ],
            out_specs=pl.BlockSpec((tile_rows, HW), lambda i: (i, 0)),
        ),
        compiler_params=pltpu.CompilerParams(
            dimension_semantics=("parallel",),
            vmem_limit_bytes=vmem_limit,
        ),
        cost_estimate=pl.CostEstimate(
            flops=2 * NC * HW, transcendentals=0,
            bytes_accessed=2 * NC * HW * x_item + NC * b_item),
    )(x2d, bias_rows)

    return out2d.reshape(N, C, H, W)


def mean_only_batch_norm_ref(x, bias):
    """Pure-JAX (f32) reference matching the PyTorch forward."""
    N, C, H, W = x.shape
    xf = x.astype(jnp.float32)
    avg = jnp.mean(xf.reshape(N, C, -1), axis=2)
    return xf - avg[:, :, None, None] + bias.astype(jnp.float32)[None, :, None, None]


if __name__ == "__main__":
    key = jax.random.PRNGKey(0)
    kx, kb = jax.random.split(key)
    ok = True

    def _check(out, ref, atol=1e-5, rtol=1e-5):
        return bool(jnp.allclose(out.astype(jnp.float32), ref, atol=atol, rtol=rtol))

    # Base case (bias zero — module init — and nonzero bias).
    x = jax.random.normal(kx, (2, 4, 16, 16), dtype=jnp.float32)
    for bias in (jnp.zeros((4,), jnp.float32),
                 jax.random.normal(kb, (4,), jnp.float32)):
        out = jax.block_until_ready(mean_only_batch_norm(x, bias))
        ok = ok and out.shape == x.shape
        ok = ok and _check(out, mean_only_batch_norm_ref(x, bias))

    # Non-multiple-of-128 spatial extent (no-pad path, masked final lane group).
    x2 = jax.random.normal(kx, (2, 4, 7, 7), dtype=jnp.float32)
    b2 = jax.random.normal(kb, (4,), dtype=jnp.float32)
    out2 = jax.block_until_ready(mean_only_batch_norm(x2, b2))
    ok = ok and _check(out2, mean_only_batch_norm_ref(x2, b2))

    # N*C not a multiple of 8 (full-dim row block).
    x3 = jax.random.normal(kx, (3, 3, 16, 16), dtype=jnp.float32)
    b3 = jax.random.normal(kb, (3,), dtype=jnp.float32)
    out3 = jax.block_until_ready(mean_only_batch_norm(x3, b3))
    ok = ok and _check(out3, mean_only_batch_norm_ref(x3, b3))

    # Exercise the large-HW two-pass path (forced, with a partial HW edge block).
    x4 = jax.random.normal(kx, (2, 4, 20, 20), dtype=jnp.float32)
    b4 = jax.random.normal(kb, (4,), dtype=jnp.float32)
    out4 = jax.block_until_ready(
        mean_only_batch_norm(x4, b4, force_two_pass=True, _two_pass_hw_tile=256))
    ok = ok and _check(out4, mean_only_batch_norm_ref(x4, b4))

    # bf16 input (f32 accumulate/add inside the kernel, cast only at the store).
    x5 = jax.random.normal(kx, (2, 4, 16, 16), dtype=jnp.float32).astype(jnp.bfloat16)
    b5 = jax.random.normal(kb, (4,), dtype=jnp.float32)
    out5 = jax.block_until_ready(mean_only_batch_norm(x5, b5))
    ok = ok and _check(out5, mean_only_batch_norm_ref(x5, b5), atol=1e-1, rtol=1e-1)

    assert ok
    print("KERNEL_OK")
</pallas_src>

<mosaic_0001>
module attributes {stable_mosaic.version = 11 : i64} {
  func.func @_mean_only_bn_kernel(%arg0: i32, %arg1: memref<8x256xf32, #tpu.memory_space<vmem>>, %arg2: memref<8x1xf32, #tpu.memory_space<vmem>>, %arg3: memref<8x256xf32, #tpu.memory_space<vmem>>) attributes {dimension_semantics = [#tpu.dimension_semantics<parallel>], iteration_bounds = array<i64: 1>, scalar_prefetch = 0 : i64, scratch_operands = 0 : i64, tpu.core_type = #tpu.core_type<tc>, window_params = [{transform_indices = @transform_0, window_bounds = array<i64: 8, 256>}, {transform_indices = @transform_1, window_bounds = array<i64: 8, 1>}, {transform_indices = @transform_2, window_bounds = array<i64: 8, 256>}]} {
    %c0 = arith.constant 0 : index
    %c0_0 = arith.constant 0 : index
    %0 = vector.load %arg1[%c0, %c0_0] : memref<8x256xf32, #tpu.memory_space<vmem>>, vector<8x256xf32>
    %cst = arith.constant dense<0.000000e+00> : vector<8xf32>
    %1 = vector.multi_reduction <add>, %0, %cst [1] : vector<8x256xf32> to vector<8xf32>
    %2 = vector.shape_cast %1 : vector<8xf32> to vector<8x1xf32>
    %cst_1 = arith.constant 3.906250e-03 : f32
    %3 = vector.broadcast %cst_1 : f32 to vector<8x1xf32>
    %4 = arith.mulf %2, %3 : vector<8x1xf32>
    %c0_2 = arith.constant 0 : index
    %c0_3 = arith.constant 0 : index
    %5 = vector.load %arg2[%c0_2, %c0_3] : memref<8x1xf32, #tpu.memory_space<vmem>>, vector<8x1xf32>
    %6 = arith.subf %5, %4 : vector<8x1xf32>
    %7 = vector.broadcast %6 : vector<8x1xf32> to vector<8x256xf32>
    %8 = arith.addf %0, %7 : vector<8x256xf32>
    %c0_4 = arith.constant 0 : index
    %c0_5 = arith.constant 0 : index
    %9 = vector.load %arg3[%c0_4, %c0_5] : memref<8x256xf32, #tpu.memory_space<vmem>>, vector<8x256xf32>
    tpu.vector_store %arg3[%c0_4, %c0_5], %8 {strides = array<i32>} : memref<8x256xf32, #tpu.memory_space<vmem>>, vector<8x256xf32>,
    return
  }
  func.func @transform_0(%arg0: i32) -> (i32, i32) {
    %c0_i32 = arith.constant 0 : i32
    %c0_i32_0 = arith.constant 0 : i32
    return %arg0, %c0_i32 : i32, i32
  }
  func.func @transform_1(%arg0: i32) -> (i32, i32) {
    %c0_i32 = arith.constant 0 : i32
    %c0_i32_0 = arith.constant 0 : i32
    return %arg0, %c0_i32 : i32, i32
  }
  func.func @transform_2(%arg0: i32) -> (i32, i32) {
    %c0_i32 = arith.constant 0 : i32
    %c0_i32_0 = arith.constant 0 : i32
    return %arg0, %c0_i32 : i32, i32
  }
}

</mosaic_0001>

<bundles_post_ra>
// kernel: tpu_custom_call.1
= control target key start
LH: loop header
LB: loop body
LE: loop exit
PB: predicated region body
PF: predicated region fallthrough
CT: control target
= control target key end

     0   :  { %7 = vsyncpa [#allocation3], 0  ;;  %s143_s0 = inlined_call_operand.hbm [shape: f32[8,256], index: 0, kind: input, shape index: {}]   ;;  %s144_s1 = inlined_call_operand.vmem [shape: f32[8,1], index: 1, kind: input, shape index: {}]   ;;  %s145_s2 = inlined_call_operand.hbm [shape: f32[8,256], index: 2, kind: output, shape index: {}]  }
   0x1   :  { %8 = vsyncpa [#allocation4], 0  ;;  %s14_s11 = sshll.u32 %s143_s0, 4  ;;  %s116_s12 = smov [#allocation2]   ;;  %s15_s11 = int_to_ptr.hbm [resolvable:$true] %s14_s11 }
   0x2   :  { %s16_s13 = sshll.u32 %s116_s12, 4  ;;  %s17_s13 = int_to_ptr.vmem [resolvable:$true] %s16_s13 }
   0x3   :  { %19 = dma.hbm_to_vmem [thread:$0]  %s15_s11, 256, %s17_s13, [#allocation3]  }
   0x4   :  { %112 = dma.done.wait [#allocation3], 256  }
   0x5   :  { %113 = vsyncadd [#allocation3], 4294967040  ;;  %v26_v0 = vld [vmem:[#allocation2] sm:$0xff]  ;;  %v27_v1 = vld [vmem:[#allocation2 + $0x8] sm:$0xff]  ;;  %v117_v3 = vmov 0   ;;  %s118_s0 = smov [#allocation5]  }
   0x6   :  { %v28_v2 = vadd.f32 %v27_v1, %v26_v0  ;;  %63 = vset.pattern.permute.xlu0 %v117_v3  ;;  %v32_v4 = vld [vmem:[%s144_s1] sm:$0xff]  ;;  %s48_s16 = sshll.u32 %s118_s0, 4  ;;  %s50_s19 = sshll.u32 %s145_s2, 4  ;;  %s49_s16 = int_to_ptr.vmem [resolvable:$true] %s48_s16  ;;  %s51_s19 = int_to_ptr.hbm [resolvable:$true] %s50_s19 }
   0x8   :  { %29 = vadd.xlane.f32.xlu0 %v28_v2 }
  0x7b   :  { %v30_v5 = vpop.xlane.xlu0 %29 }
  0x7c   :  { %v31_v6 = vmul.f32 0.00390625, %v30_v5 }
  0x7e   :  { %v33_v7 = vsub.f32 %v32_v4, %v31_v6 }
  0x80   :  { %36 = vperm.xlu0 %63, %v33_v7  }
  0xf2   :  { %v37_v8 = vpop.permute.xlu0 %36 }
  0xf3   :  { %v39_v9 = vadd.f32 %v37_v8, %v26_v0  ;;  %v40_v10 = vadd.f32 %v37_v8, %v27_v1 }
  0xf5   :  { %41 = vst [vmem:[#allocation5] sm:$0xff] %v39_v9 }
  0xf6   :  { %42 = vst [vmem:[#allocation5 + $0x8] sm:$0xff] %v40_v10 }
  0xf7   :  { %53 = dma.vmem_to_hbm [thread:$0]  %s49_s16, 256, %s51_s19, [#allocation4]  }
  0xf8   :  { %114 = dma.done.wait [#allocation4], 256  }
  0xf9   :  { %115 = vsyncadd [#allocation4], 4294967040 }
  0xfa   :  { %58 = vsyncpa [#allocation3], 1 }
  0xfb   :  { %59 = vsyncpa [#allocation4], 1 }

</bundles_post_ra>
